<compile_context>
chip_gen: v7x
topology: tpu7x:2x2x1
jax: 0.10.0
libtpu: 0.0.40
codegen_flags: <defaults>
</compile_context>

<pallas_src>
import jax
import jax.numpy as jnp
from jax.experimental import pallas as pl
from jax.experimental.pallas import tpu as pltpu


def _round_up(n, m):
    return ((n + m - 1) // m) * m


def _choose_tile(B, block_b):
    """Pick the batch tile: big enough to amortize per-step overhead, small
    enough to give >=8 grid steps at large B (v7x megacore + pipeline depth),
    and preferably a divisor of B so x never needs a whole-array pad."""
    TB = min(block_b, _round_up(B, 8))
    min_blocks = 8
    if B >= min_blocks * 8:
        TB = min(TB, max(8, _round_up((B + min_blocks - 1) // min_blocks, 8)))
    if B % TB != 0:
        # try to find a multiple-of-8 divisor of B without shrinking TB > 2x
        t = TB - (TB % 8) if TB % 8 else TB
        lo = max(8, TB // 2)
        while t >= lo and B % t != 0:
            t -= 8
        if t >= lo and B % t == 0:
            TB = t
    return TB


def mlp_kernel(x_ref, w1_ref, b1_ref, w2_ref, b2_ref, o_ref):
    # fc1: (TB, D) @ (D, H) on the MXU, f32 accumulation; bias broadcast.
    # x is streamed in f32; cast (if weights are bf16) happens here in VMEM,
    # not as an extra HBM pass in the wrapper.
    x = x_ref[...].astype(w1_ref.dtype)
    h_lin = jnp.dot(x, w1_ref[...],
                    preferred_element_type=jnp.float32) + b1_ref[...]

    # sigmoid in f32 (EUP slot; v5e has no bf16 VPU/EUP).
    h = jax.nn.sigmoid(h_lin)

    # fc2: (TB, H) @ (H, O), f32 accumulation.
    logits = jnp.dot(h.astype(w2_ref.dtype), w2_ref[...],
                     preferred_element_type=jnp.float32) + b2_ref[...]

    # Numerically stable log_softmax over the (unpadded) feature axis.
    m = jnp.max(logits, axis=-1, keepdims=True)
    shifted = logits - m
    lse = jnp.log(jnp.sum(jnp.exp(shifted), axis=-1, keepdims=True))
    o_ref[...] = (shifted - lse).astype(o_ref.dtype)


def model_forward(x, w1, b1, w2, b2, *, block_b=2048, use_bf16=False):
    """Forward pass of Model_1.

    x:  (B, D) float32
    w1: (D, H), b1: (1, H), w2: (H, O), b2: (1, O)  -- weights pre-transposed.
    Returns (B, O) float32 log-probabilities.
    """
    B, D = x.shape
    H = w1.shape[1]
    O = w2.shape[1]

    # Optional bf16 for the (tiny, VMEM-resident) weights only; x stays f32.
    if use_bf16:
        w1 = w1.astype(jnp.bfloat16)
        w2 = w2.astype(jnp.bfloat16)

    # ---- batch tiling: weights resident, x / out streamed -------------------
    TB = _choose_tile(B, block_b)
    B_pad = _round_up(B, TB)
    if B_pad != B:
        x = jnp.pad(x, ((0, B_pad - B), (0, 0)))

    grid = (B_pad // TB,)

    w_bytes = (w1.size * w1.dtype.itemsize + b1.size * b1.dtype.itemsize +
               w2.size * w2.dtype.itemsize + b2.size * b2.dtype.itemsize)
    cost = pl.CostEstimate(
        flops=2 * B_pad * (D * H + H * O),
        transcendentals=B_pad * (H + O),
        bytes_accessed=B_pad * D * x.dtype.itemsize + w_bytes + B_pad * O * 4,
    )

    out = pl.pallas_call(
        mlp_kernel,
        out_shape=jax.ShapeDtypeStruct((B_pad, O), jnp.float32),
        grid=grid,
        in_specs=[
            pl.BlockSpec((TB, D), lambda i: (i, 0)),   # x: streamed per tile
            pl.BlockSpec((D, H), lambda i: (0, 0)),    # w1: resident
            pl.BlockSpec((1, H), lambda i: (0, 0)),    # b1: resident
            pl.BlockSpec((H, O), lambda i: (0, 0)),    # w2: resident
            pl.BlockSpec((1, O), lambda i: (0, 0)),    # b2: resident
        ],
        out_specs=pl.BlockSpec((TB, O), lambda i: (i, 0)),
        compiler_params=pltpu.CompilerParams(
            # shard the batch axis across v7x's 2 TensorCores; no-op on v5e/v6e
            dimension_semantics=("parallel",),
            # explicit, modest budget -> safe on v7x's 64 MiB physical VMEM
            vmem_limit_bytes=32 * 1024 * 1024,
        ),
        cost_estimate=cost,
    )(x, w1, b1, w2, b2)

    # drop padded batch rows (no output-lane padding anymore)
    return out[:B, :]


def reference_forward(x, w1, b1, w2, b2):
    h = jax.nn.sigmoid(x @ w1 + b1)
    logits = h @ w2 + b2
    return jax.nn.log_softmax(logits, axis=1)


if __name__ == "__main__":
    # Small shapes consistent with the module's forward: (batch, input_dim)
    batch, input_dim, hidden_size, out_dim = 64, 32, 32, 10

    key = jax.random.PRNGKey(0)
    kx, k1, k2, k3, k4 = jax.random.split(key, 5)

    x = jax.random.normal(kx, (batch, input_dim), dtype=jnp.float32)

    # Deterministic params (Linear weight stored as (in, out), bias as (1, out))
    w1 = jax.random.normal(k1, (input_dim, hidden_size), dtype=jnp.float32) * 0.1
    b1 = jax.random.normal(k2, (1, hidden_size), dtype=jnp.float32) * 0.1
    w2 = jax.random.normal(k3, (hidden_size, out_dim), dtype=jnp.float32) * 0.1
    b2 = jax.random.normal(k4, (1, out_dim), dtype=jnp.float32) * 0.1

    ref = reference_forward(x, w1, b1, w2, b2)

    # Strict-accuracy f32 path (matches the PyTorch module's default precision).
    out_f32 = jax.block_until_ready(model_forward(x, w1, b1, w2, b2, use_bf16=False))
    assert out_f32.shape == (batch, out_dim)
    assert jnp.allclose(out_f32, ref, atol=1e-5, rtol=1e-5), "f32 mismatch vs reference"

    # bf16-weight fast path (weights resident & tiny; x stays f32 into the kernel).
    out_bf16 = jax.block_until_ready(model_forward(x, w1, b1, w2, b2, use_bf16=True))
    assert out_bf16.shape == (batch, out_dim)
    assert jnp.allclose(out_bf16, ref, atol=5e-2, rtol=0), "bf16 mismatch vs reference"

    print("KERNEL_OK")
</pallas_src>

<mosaic_0001>
module attributes {stable_mosaic.version = 11 : i64} {
  func.func @mlp_kernel(%arg0: i32, %arg1: memref<8x32xf32, #tpu.memory_space<vmem>>, %arg2: memref<32x32xf32, #tpu.memory_space<vmem>>, %arg3: memref<1x32xf32, #tpu.memory_space<vmem>>, %arg4: memref<32x10xf32, #tpu.memory_space<vmem>>, %arg5: memref<1x10xf32, #tpu.memory_space<vmem>>, %arg6: memref<8x10xf32, #tpu.memory_space<vmem>>) attributes {dimension_semantics = [#tpu.dimension_semantics<parallel>], iteration_bounds = array<i64: 8>, scalar_prefetch = 0 : i64, scratch_operands = 0 : i64, tpu.core_type = #tpu.core_type<tc>, window_params = [{transform_indices = @transform_0, window_bounds = array<i64: 8, 32>}, {pipeline_mode = #tpu.pipeline_mode<synchronous>, transform_indices = @transform_1, window_bounds = array<i64: 32, 32>}, {pipeline_mode = #tpu.pipeline_mode<synchronous>, transform_indices = @transform_2, window_bounds = array<i64: 1, 32>}, {pipeline_mode = #tpu.pipeline_mode<synchronous>, transform_indices = @transform_3, window_bounds = array<i64: 32, 10>}, {pipeline_mode = #tpu.pipeline_mode<synchronous>, transform_indices = @transform_4, window_bounds = array<i64: 1, 10>}, {transform_indices = @transform_5, window_bounds = array<i64: 8, 10>}]} {
    %c0 = arith.constant 0 : index
    %c0_0 = arith.constant 0 : index
    %0 = vector.load %arg1[%c0, %c0_0] : memref<8x32xf32, #tpu.memory_space<vmem>>, vector<8x32xf32>
    %c0_1 = arith.constant 0 : index
    %c0_2 = arith.constant 0 : index
    %1 = vector.load %arg2[%c0_1, %c0_2] : memref<32x32xf32, #tpu.memory_space<vmem>>, vector<32x32xf32>
    %cst = arith.constant dense<0.000000e+00> : vector<8x32xf32>
    %2 = tpu.matmul %0, %1, %cst {dimension_numbers = #tpu.dot_dimension_numbers<[1], [0], [0], [1], [0, 0, 1, 1], [], []>} : vector<8x32xf32>, vector<32x32xf32>, vector<8x32xf32> -> vector<8x32xf32>
    %c0_3 = arith.constant 0 : index
    %c0_4 = arith.constant 0 : index
    %3 = vector.load %arg3[%c0_3, %c0_4] : memref<1x32xf32, #tpu.memory_space<vmem>>, vector<1x32xf32>
    %4 = vector.broadcast %3 : vector<1x32xf32> to vector<8x32xf32>
    %5 = arith.addf %2, %4 : vector<8x32xf32>
    %6 = arith.negf %5 : vector<8x32xf32>
    %7 = math.exp %6 : vector<8x32xf32>
    %cst_5 = arith.constant 1.000000e+00 : f32
    %8 = vector.broadcast %cst_5 : f32 to vector<8x32xf32>
    %9 = arith.addf %8, %7 : vector<8x32xf32>
    %10 = arith.divf %8, %9 : vector<8x32xf32>
    %c0_6 = arith.constant 0 : index
    %c0_7 = arith.constant 0 : index
    %11 = vector.load %arg4[%c0_6, %c0_7] : memref<32x10xf32, #tpu.memory_space<vmem>>, vector<32x10xf32>
    %cst_8 = arith.constant dense<0.000000e+00> : vector<8x10xf32>
    %12 = tpu.matmul %10, %11, %cst_8 {dimension_numbers = #tpu.dot_dimension_numbers<[1], [0], [0], [1], [0, 0, 1, 1], [], []>} : vector<8x32xf32>, vector<32x10xf32>, vector<8x10xf32> -> vector<8x10xf32>
    %c0_9 = arith.constant 0 : index
    %c0_10 = arith.constant 0 : index
    %13 = vector.load %arg5[%c0_9, %c0_10] : memref<1x10xf32, #tpu.memory_space<vmem>>, vector<1x10xf32>
    %14 = vector.broadcast %13 : vector<1x10xf32> to vector<8x10xf32>
    %15 = arith.addf %12, %14 : vector<8x10xf32>
    %cst_11 = arith.constant dense<0xFF800000> : vector<8xf32>
    %16 = vector.multi_reduction <maximumf>, %15, %cst_11 [1] : vector<8x10xf32> to vector<8xf32>
    %17 = vector.shape_cast %16 : vector<8xf32> to vector<8x1xf32>
    %18 = vector.broadcast %17 : vector<8x1xf32> to vector<8x10xf32>
    %19 = arith.subf %15, %18 : vector<8x10xf32>
    %20 = math.exp %19 : vector<8x10xf32>
    %cst_12 = arith.constant dense<0.000000e+00> : vector<8xf32>
    %21 = vector.multi_reduction <add>, %20, %cst_12 [1] : vector<8x10xf32> to vector<8xf32>
    %22 = vector.shape_cast %21 : vector<8xf32> to vector<8x1xf32>
    %23 = math.log %22 : vector<8x1xf32>
    %24 = vector.broadcast %23 : vector<8x1xf32> to vector<8x10xf32>
    %25 = arith.subf %19, %24 : vector<8x10xf32>
    %c0_13 = arith.constant 0 : index
    %c0_14 = arith.constant 0 : index
    %26 = vector.load %arg6[%c0_13, %c0_14] : memref<8x10xf32, #tpu.memory_space<vmem>>, vector<8x10xf32>
    tpu.vector_store %arg6[%c0_13, %c0_14], %25 {strides = array<i32>} : memref<8x10xf32, #tpu.memory_space<vmem>>, vector<8x10xf32>,
    return
  }
  func.func @transform_0(%arg0: i32) -> (i32, i32) {
    %c0_i32 = arith.constant 0 : i32
    %c0_i32_0 = arith.constant 0 : i32
    return %arg0, %c0_i32 : i32, i32
  }
  func.func @transform_1(%arg0: i32) -> (i32, i32) {
    %c0_i32 = arith.constant 0 : i32
    %c0_i32_0 = arith.constant 0 : i32
    %c0_i32_1 = arith.constant 0 : i32
    return %c0_i32, %c0_i32_0 : i32, i32
  }
  func.func @transform_2(%arg0: i32) -> (i32, i32) {
    %c0_i32 = arith.constant 0 : i32
    %c0_i32_0 = arith.constant 0 : i32
    %c0_i32_1 = arith.constant 0 : i32
    return %c0_i32, %c0_i32_0 : i32, i32
  }
  func.func @transform_3(%arg0: i32) -> (i32, i32) {
    %c0_i32 = arith.constant 0 : i32
    %c0_i32_0 = arith.constant 0 : i32
    %c0_i32_1 = arith.constant 0 : i32
    return %c0_i32, %c0_i32_0 : i32, i32
  }
  func.func @transform_4(%arg0: i32) -> (i32, i32) {
    %c0_i32 = arith.constant 0 : i32
    %c0_i32_0 = arith.constant 0 : i32
    %c0_i32_1 = arith.constant 0 : i32
    return %c0_i32, %c0_i32_0 : i32, i32
  }
  func.func @transform_5(%arg0: i32) -> (i32, i32) {
    %c0_i32 = arith.constant 0 : i32
    %c0_i32_0 = arith.constant 0 : i32
    return %arg0, %c0_i32 : i32, i32
  }
}

</mosaic_0001>

<bundles_post_ra>
// kernel: tpu_custom_call.1
= control target key start
LH: loop header
LB: loop body
LE: loop exit
PB: predicated region body
PF: predicated region fallthrough
CT: control target
= control target key end

     0   :  { %s581_s18 = smov 0   ;;  %s640_s0 = inlined_call_operand.vmem [shape: f32[64,32], index: 0, kind: input, shape index: {}]   ;;  %s641_s1 = inlined_call_operand.vmem [shape: f32[32,32], index: 1, kind: input, shape index: {}]   ;;  %s642_s2 = inlined_call_operand.vmem [shape: f32[1,32], index: 2, kind: input, shape index: {}]   ;;  %s643_s3 = inlined_call_operand.vmem [shape: f32[32,10], index: 3, kind: input, shape index: {}]   ;;  %s644_s4 = inlined_call_operand.vmem [shape: f32[1,10], index: 4, kind: input, shape index: {}]   ;;  %s645_s5 = inlined_call_operand.vmem [shape: f32[64,10], index: 5, kind: output, shape index: {}]  }
   0x1 LB: > { %s463_s19 = sadd.s32 4294967295, %s546_s18   ;;  %p467_p0 = scmp.ge.s32.totalorder %s546_s18, 1  ;;  %s546_s18 = sphi %s581_s18, %s15_s18  }
   0x2   : > { %p186_p1 = scmp.lt.s32.totalorder %s546_s18, 9 }
   0x4   : > { %p187_p2 = pnand %p467_p0, %p186_p1 }
   0x5   : > { %v221_v0 = vld [vmem:[%s641_s1] sm:$0xff] (!%p187_p2)  ;;  %v222_v1 = vld [vmem:[%s641_s1 + $0x8] sm:$0xff] (!%p187_p2)  ;;  %v223_v2 = vld [vmem:[%s641_s1 + $0x10] sm:$0xff] (!%p187_p2)  ;;  %v548_v3 = vmov (!%p187_p2), 0.0|0.0   ;;  %vm549_vm0 = vmmov (!%p187_p2), 0   ;;  %v550_v6 = vmov (!%p187_p2), 0.0  }
   0x6   : > { %190 = sbr.rel (%p187_p2) target bundleno = 788 (0x314), region = 40  ;;  %509 = vmatprep.subr.bf16.mxu0 (!%p187_p2), %v548_v3  ;;  %v510_v4 = vpack.c.bf16 (!%p187_p2), %v222_v1, %v221_v0  ;;  %v224_v5 = vld [vmem:[%s641_s1 + $0x18] sm:$0xff] (!%p187_p2)  ;;  %495 = vmatprep.mubr.msk.f32.mxu0 (!%p187_p2), %vm549_vm0, %v550_v6  ;;  %p212_p3 = scmp.lt.s32.totalorder (!%p187_p2), %s463_s19, 7  ;;  %vm232_vm1 = vcmask (!%p187_p2), 261120   ;;  %v312_v9 = vld [vmem:[%s643_s3] sm:$0xff] (!%p187_p2)  ;;  %v313_v10 = vld [vmem:[%s643_s3 + $0x8] sm:$0xff] (!%p187_p2) }
   0x7   : > { %515 = vmatprep.subr.bf16.mxu1 (!%p187_p2), %v548_v3  ;;  %506 = vmatprep.mubr.msk.f32.mxu1 (!%p187_p2), %vm549_vm0, %v550_v6  ;;  %v513_v7 = vpack.c.bf16 (!%p187_p2), %v224_v5, %v223_v2  ;;  %v314_v11 = vld [vmem:[%s643_s3 + $0x10] sm:$0xff] (!%p187_p2)  ;;  %v516_v12 = vpack.c.bf16 (!%p187_p2), %v313_v10, %v312_v9  ;;  %v315_v13 = vld [vmem:[%s643_s3 + $0x18] sm:$0xff] (!%p187_p2)  ;;  %v470_v15 = vld [vmem:[%s642_s2] ss:$0 sm:$0xff] (!%p187_p2)  ;;  %vm396_vm2 = vcmask (!%p187_p2), 80896  }
   0x8   : > { %511 = vmatpush3.bf16.msra.mxu0 (!%p187_p2), %v510_v4  ;;  %v519_v14 = vpack.c.bf16 (!%p187_p2), %v315_v13, %v314_v11  ;;  %v473_v23 = vld [vmem:[%s644_s4] ss:$0 sm:$0xff] (!%p187_p2) }
   0x9   : > { %512 = vmatprep.subr.bf16.mxu0 (!%p187_p2), %v548_v3  ;;  %517 = vmatpush3.bf16.msra.mxu1 (!%p187_p2), %v516_v12 }
   0xa   : > { %518 = vmatprep.subr.bf16.mxu1 (!%p187_p2), %v548_v3 }
   0xc   : > { %514 = vmatpush3.bf16.msra.mxu0 (!%p187_p2), %v513_v7 }
   0xd   : > { %s647_s19 = smov (!%p212_p3, %s463_s19), 7  ;;  %520 = vmatpush3.bf16.msra.mxu1 %v519_v14 }
   0xe   : > { %s468_s28 = sshll.u32 %s647_s19, 3 }
   0xf   : > { %s215_s6 = scalar_lea.vmem %s640_s0, %s468_s28  ;;  %s219_s23 = scalar_lea.vmem %s645_s5, %s468_s28 }
  0x10   : > { %v220_v8 = vld [vmem:[%s215_s6] sm:$0xff] }
  0x11   : > { %496 = vmatmul.mubr.msk.f32.vlgmr.msra.gmra.mrb[0].mxu0 %vm232_vm1, %v220_v8 }
  0xe4   : > { %v302_v16 = vpop.f32.mrb[0].mxu0 }
  0xe5   : > { %v303_v17 = vadd.f32 %v470_v15, %v302_v16  ;;  %v497_v18 = vpop.f32.mrb[1].mxu0 }
  0xe7   : > { %v472_v19 = vmul.f32 -1.442695, %v303_v17 }
  0xe9   : > { %532 = vpow2.f32 %v472_v19 }
  0xf3   : > { %v533_v20 = vpop.eup %532 }
  0xf4   : > { %v309_v21 = vadd.f32 1.0, %v533_v20 }
  0xf6   : > { %534 = vrcp.f32 %v309_v21 }
 0x100   : > { %v535_v22 = vpop.eup %534 }
 0x101   : > { %507 = vmatmul.mubr.msk.f32.vlgmr.msra.gmra.mrb[0].mxu1 %vm232_vm1, %v535_v22 }
 0x1d4   : > { %v392_v24 = vpop.f32.mrb[0].mxu1 }
 0x1d5   : > { %v393_v25 = vadd.f32 %v473_v23, %v392_v24  ;;  %v508_v26 = vpop.f32.mrb[1].mxu1 }
 0x1d7   : > { %v397_v27 = vsel %vm396_vm2, %v393_v25, -inf }
 0x1d8   : > { %398 = vmax.xlane.f32.xlu0 %v397_v27 }
 0x265   : > { %v399_v28 = vpop.xlane.xlu0 %398 }
 0x266   : > { %v400_v29 = vsub.f32 %v393_v25, %v399_v28 }
 0x268   : > { %v401_v30 = vmul.f32 1.442695, %v400_v29 }
 0x26a   : > { %536 = vpow2.f32 %v401_v30 }
 0x274   : > { %v537_v31 = vpop.eup %536 }
 0x275   : > { %v403_v32 = vsel %vm396_vm2, %v537_v31, 0.0 }
 0x276   : > { %404 = vadd.xlane.f32.xlu0 %v403_v32 }
 0x303   : > { %v405_v33 = vpop.xlane.xlu0 %404 }
 0x304   : > { %538 = vlog2.f32 %v405_v33 }
 0x30e   : > { %v539_v34 = vpop.eup %538 }
 0x30f   : > { %v407_v35 = vmul.f32 0.6931472, %v539_v34 }
 0x311   : > { %v408_v36 = vsub.f32 %v400_v29, %v407_v35 }
 0x313   : > { %409 = vst.msk [vmem:[%s219_s23] sm:$0xff] %vm396_vm2, %v408_v36 }
 0x314 PF: > { %s15_s18 = sadd.s32 1, %s546_s18  }
 0x315   : > { %p12_p4 = scmp.ge.s32.totalorder %s15_s18, 10  }
 0x317   :  { %14 = sbr.rel (!%p12_p4) target bundleno = 1 (0x1), region = 70 }

</bundles_post_ra>
